<compile_context>
chip_gen: v5e
topology: v5e:2x2
jax: 0.10.0
libtpu: 0.0.40
codegen_flags: <defaults>
</compile_context>

<pallas_src>
import functools

import jax
import jax.numpy as jnp
from jax.experimental import pallas as pl
from jax.experimental.pallas import tpu as pltpu

# ----------------------------- config (synthetic) -----------------------------
NUM_LAYERS = 2        # config.num_layers
DEPTH = 64            # config.depth (filters)
EMBEDDING_DEPTH = 32  # config.embedding_depth
OUTPUT_DIM = 1
LN_EPS = 1e-5
DEFAULT_TILE_B = 1024  # rows of the batch per grid step (multiple of 128)


def _round_up(x, m):
    return (x + m - 1) // m * m


# ------------------------------- Pallas kernel --------------------------------
def _mlp_kernel(x_ref, w_in_ref, b_in_ref, w_h_ref, b_h_ref, g_ref, beta_ref,
                w_out_ref, b_out_ref, o_ref, *, num_layers):
    # x_ref: (EMB, TILE_B) bf16 — features on sublanes, batch on lanes.
    x = x_ref[...]

    # Input projection: bf16 MXU matmul, f32 accumulate.
    h = jnp.dot(w_in_ref[...], x, preferred_element_type=jnp.float32)
    h = h + b_in_ref[...]                       # (D,1) broadcast over lanes
    h = jax.nn.gelu(h, approximate=True)        # f32 elementwise

    # Hidden residual blocks: Linear -> LayerNorm -> GELU (+ residual).
    for l in range(num_layers):
        z = jnp.dot(w_h_ref[l], h.astype(jnp.bfloat16),
                    preferred_element_type=jnp.float32) + b_h_ref[l]
        # LayerNorm over the feature (sublane) axis, stats in f32.
        mu = jnp.mean(z, axis=0, keepdims=True)                 # (1, TILE_B)
        var = jnp.mean((z - mu) * (z - mu), axis=0, keepdims=True)
        z = (z - mu) * jax.lax.rsqrt(var + LN_EPS)
        z = z * g_ref[l] + beta_ref[l]
        h = jax.nn.gelu(z, approximate=True) + h  # dropout == identity (eval)

    # Output head (N=1): VPU multiply + sublane reduce -> lane-dense (1, TILE_B).
    y = jnp.sum(h * w_out_ref[...], axis=0, keepdims=True) + b_out_ref[...]
    o_ref[...] = y.astype(o_ref.dtype)


# --------------------------------- wrapper ------------------------------------
def embedding_regressor_forward(embedding, params, tile_b=DEFAULT_TILE_B):
    """embedding: [B, EMBEDDING_DEPTH] float32 -> [B, 1] float32."""
    batch = embedding.shape[0]
    tb = min(tile_b, _round_up(batch, 128))     # 128-lane aligned tiles
    b_pad = _round_up(batch, tb)
    num_tiles = b_pad // tb

    # Layout plumbing (outside the kernel): pad batch, put batch on the lane
    # axis, cast matmul operands to bf16. Padded columns are sliced off below.
    x = embedding.astype(jnp.bfloat16)
    if b_pad != batch:
        x = jnp.pad(x, ((0, b_pad - batch), (0, 0)))
    x_t = x.T                                                    # (EMB, B_pad)

    w_in_t = params["w_in"].T.astype(jnp.bfloat16)               # (D, E)
    b_in_t = params["b_in"].reshape(DEPTH, 1)                    # (D, 1) f32
    w_h_t = jnp.transpose(params["w_h"], (0, 2, 1)).astype(jnp.bfloat16)
    b_h_t = params["b_h"].reshape(NUM_LAYERS, DEPTH, 1)
    g_t = params["gamma"].reshape(NUM_LAYERS, DEPTH, 1)
    beta_t = params["beta"].reshape(NUM_LAYERS, DEPTH, 1)
    w_out_c = params["w_out"].reshape(DEPTH, 1)                  # f32 (VPU head)
    b_out = params["b_out"].reshape(1, 1)

    def resident(*shape):  # weights: full block, constant index -> VMEM resident
        return pl.BlockSpec(shape, lambda i, s=shape: (0,) * len(s))

    out = pl.pallas_call(
        functools.partial(_mlp_kernel, num_layers=NUM_LAYERS),
        out_shape=jax.ShapeDtypeStruct((1, b_pad), jnp.float32),
        grid=(num_tiles,),
        in_specs=[
            pl.BlockSpec((EMBEDDING_DEPTH, tb), lambda i: (0, i)),  # x_t tile
            resident(DEPTH, EMBEDDING_DEPTH),                        # w_in_t
            resident(DEPTH, 1),                                      # b_in_t
            resident(NUM_LAYERS, DEPTH, DEPTH),                      # w_h_t
            resident(NUM_LAYERS, DEPTH, 1),                          # b_h_t
            resident(NUM_LAYERS, DEPTH, 1),                          # gamma
            resident(NUM_LAYERS, DEPTH, 1),                          # beta
            resident(DEPTH, 1),                                      # w_out
            resident(1, 1),                                          # b_out
        ],
        out_specs=pl.BlockSpec((1, tb), lambda i: (0, i)),
        compiler_params=pltpu.CompilerParams(
            dimension_semantics=("parallel",)),
    )(x_t, w_in_t, b_in_t, w_h_t, b_h_t, g_t, beta_t, w_out_c, b_out)

    return out.reshape(b_pad, 1)[:batch]


# ------------------------- deterministic param init ---------------------------
def init_params(key):
    ks = jax.random.split(key, 4)

    def glorot(k, shape):
        fan_in, fan_out = shape[-2], shape[-1]
        scale = jnp.sqrt(6.0 / (fan_in + fan_out))
        return jax.random.uniform(k, shape, jnp.float32, -scale, scale)

    return {
        "w_in": glorot(ks[0], (EMBEDDING_DEPTH, DEPTH)),
        "b_in": jnp.zeros((1, DEPTH), jnp.float32),
        "w_h": glorot(ks[1], (NUM_LAYERS, DEPTH, DEPTH)),
        "b_h": jnp.zeros((NUM_LAYERS, 1, DEPTH), jnp.float32),
        "gamma": jnp.ones((NUM_LAYERS, 1, DEPTH), jnp.float32),
        "beta": jnp.zeros((NUM_LAYERS, 1, DEPTH), jnp.float32),
        "w_out": glorot(ks[2], (DEPTH, OUTPUT_DIM)),
        "b_out": jnp.zeros((1, OUTPUT_DIM), jnp.float32),
    }


# ------------------------------ pure-JAX reference -----------------------------
def reference_forward(x, p):
    # Mirrors the kernel's precision choices (bf16 matmul operands, f32 else).
    h = jnp.dot(x.astype(jnp.bfloat16), p["w_in"].astype(jnp.bfloat16),
                preferred_element_type=jnp.float32) + p["b_in"]
    h = jax.nn.gelu(h, approximate=True)
    for l in range(NUM_LAYERS):
        z = jnp.dot(h.astype(jnp.bfloat16), p["w_h"][l].astype(jnp.bfloat16),
                    preferred_element_type=jnp.float32) + p["b_h"][l]
        mu = jnp.mean(z, -1, keepdims=True)
        var = jnp.mean((z - mu) ** 2, -1, keepdims=True)
        z = (z - mu) * jax.lax.rsqrt(var + LN_EPS) * p["gamma"][l] + p["beta"][l]
        h = jax.nn.gelu(z, approximate=True) + h
    return h @ p["w_out"] + p["b_out"]


if __name__ == "__main__":
    key = jax.random.PRNGKey(0)
    k_param, k_x = jax.random.split(key)
    params = init_params(k_param)

    # Small shape consistent with the module (single padded tile).
    batch = 8
    embedding = jax.random.normal(k_x, (batch, EMBEDDING_DEPTH), jnp.float32)
    out = jax.block_until_ready(embedding_regressor_forward(embedding, params))
    ref = reference_forward(embedding, params)
    assert out.shape == (batch, OUTPUT_DIM)
    assert jnp.allclose(out, ref, atol=1e-2, rtol=1e-2), (out, ref)

    # Multi-tile + remainder path (exercises the batch grid, pipelining, padding).
    batch2 = 300
    emb2 = jax.random.normal(jax.random.PRNGKey(1), (batch2, EMBEDDING_DEPTH),
                             jnp.float32)
    out2 = jax.block_until_ready(
        embedding_regressor_forward(emb2, params, tile_b=128))
    ref2 = reference_forward(emb2, params)
    assert out2.shape == (batch2, OUTPUT_DIM)
    assert jnp.allclose(out2, ref2, atol=1e-2, rtol=1e-2)

    print("KERNEL_OK")
</pallas_src>

<mosaic_0001>
module attributes {stable_mosaic.version = 11 : i64} {
  func.func @_mlp_kernel(%arg0: i32, %arg1: memref<32x128xbf16, #tpu.memory_space<vmem>>, %arg2: memref<64x32xbf16, #tpu.memory_space<vmem>>, %arg3: memref<64x1xf32, #tpu.memory_space<vmem>>, %arg4: memref<2x64x64xbf16, #tpu.memory_space<vmem>>, %arg5: memref<2x64x1xf32, #tpu.memory_space<vmem>>, %arg6: memref<2x64x1xf32, #tpu.memory_space<vmem>>, %arg7: memref<2x64x1xf32, #tpu.memory_space<vmem>>, %arg8: memref<64x1xf32, #tpu.memory_space<vmem>>, %arg9: memref<1x1xf32, #tpu.memory_space<vmem>>, %arg10: memref<1x128xf32, #tpu.memory_space<vmem>>) attributes {dimension_semantics = [#tpu.dimension_semantics<parallel>], iteration_bounds = array<i64: 1>, scalar_prefetch = 0 : i64, scratch_operands = 0 : i64, tpu.core_type = #tpu.core_type<tc>, window_params = [{transform_indices = @transform_0, window_bounds = array<i64: 32, 128>}, {pipeline_mode = #tpu.pipeline_mode<synchronous>, transform_indices = @transform_1, window_bounds = array<i64: 64, 32>}, {pipeline_mode = #tpu.pipeline_mode<synchronous>, transform_indices = @transform_2, window_bounds = array<i64: 64, 1>}, {pipeline_mode = #tpu.pipeline_mode<synchronous>, transform_indices = @transform_3, window_bounds = array<i64: 2, 64, 64>}, {pipeline_mode = #tpu.pipeline_mode<synchronous>, transform_indices = @transform_4, window_bounds = array<i64: 2, 64, 1>}, {pipeline_mode = #tpu.pipeline_mode<synchronous>, transform_indices = @transform_5, window_bounds = array<i64: 2, 64, 1>}, {pipeline_mode = #tpu.pipeline_mode<synchronous>, transform_indices = @transform_6, window_bounds = array<i64: 2, 64, 1>}, {pipeline_mode = #tpu.pipeline_mode<synchronous>, transform_indices = @transform_7, window_bounds = array<i64: 64, 1>}, {pipeline_mode = #tpu.pipeline_mode<synchronous>, transform_indices = @transform_8, window_bounds = array<i64: 1, 1>}, {transform_indices = @transform_9, window_bounds = array<i64: 1, 128>}]} {
    %c0 = arith.constant 0 : index
    %c0_0 = arith.constant 0 : index
    %0 = vector.load %arg1[%c0, %c0_0] : memref<32x128xbf16, #tpu.memory_space<vmem>>, vector<32x128xbf16>
    %c0_1 = arith.constant 0 : index
    %c0_2 = arith.constant 0 : index
    %1 = vector.load %arg2[%c0_1, %c0_2] : memref<64x32xbf16, #tpu.memory_space<vmem>>, vector<64x32xbf16>
    %cst = arith.constant dense<0.000000e+00> : vector<64x128xf32>
    %2 = tpu.matmul %1, %0, %cst {dimension_numbers = #tpu.dot_dimension_numbers<[1], [0], [0], [1], [0, 0, 1, 1], [], []>} : vector<64x32xbf16>, vector<32x128xbf16>, vector<64x128xf32> -> vector<64x128xf32>
    %c0_3 = arith.constant 0 : index
    %c0_4 = arith.constant 0 : index
    %3 = vector.load %arg3[%c0_3, %c0_4] : memref<64x1xf32, #tpu.memory_space<vmem>>, vector<64x1xf32>
    %4 = vector.broadcast %3 : vector<64x1xf32> to vector<64x128xf32>
    %5 = arith.addf %2, %4 : vector<64x128xf32>
    %6 = arith.mulf %5, %5 : vector<64x128xf32>
    %7 = arith.mulf %5, %6 : vector<64x128xf32>
    %cst_5 = arith.constant 4.471500e-02 : f32
    %8 = vector.broadcast %cst_5 : f32 to vector<64x128xf32>
    %9 = arith.mulf %8, %7 : vector<64x128xf32>
    %10 = arith.addf %5, %9 : vector<64x128xf32>
    %cst_6 = arith.constant 0.797884583 : f32
    %11 = vector.broadcast %cst_6 : f32 to vector<64x128xf32>
    %12 = arith.mulf %11, %10 : vector<64x128xf32>
    %13 = math.tanh %12 : vector<64x128xf32>
    %cst_7 = arith.constant 1.000000e+00 : f32
    %14 = vector.broadcast %cst_7 : f32 to vector<64x128xf32>
    %15 = arith.addf %14, %13 : vector<64x128xf32>
    %cst_8 = arith.constant 5.000000e-01 : f32
    %16 = vector.broadcast %cst_8 : f32 to vector<64x128xf32>
    %17 = arith.mulf %16, %15 : vector<64x128xf32>
    %18 = arith.mulf %5, %17 : vector<64x128xf32>
    %c0_9 = arith.constant 0 : index
    %c0_10 = arith.constant 0 : index
    %c0_11 = arith.constant 0 : index
    %19 = vector.load %arg4[%c0_9, %c0_10, %c0_11] : memref<2x64x64xbf16, #tpu.memory_space<vmem>>, vector<1x64x64xbf16>
    %20 = vector.shape_cast %19 : vector<1x64x64xbf16> to vector<64x64xbf16>
    %21 = arith.truncf %18 : vector<64x128xf32> to vector<64x128xbf16>
    %cst_12 = arith.constant dense<0.000000e+00> : vector<64x128xf32>
    %22 = tpu.matmul %20, %21, %cst_12 {dimension_numbers = #tpu.dot_dimension_numbers<[1], [0], [0], [1], [0, 0, 1, 1], [], []>} : vector<64x64xbf16>, vector<64x128xbf16>, vector<64x128xf32> -> vector<64x128xf32>
    %c0_13 = arith.constant 0 : index
    %c0_14 = arith.constant 0 : index
    %c0_15 = arith.constant 0 : index
    %23 = vector.load %arg5[%c0_13, %c0_14, %c0_15] : memref<2x64x1xf32, #tpu.memory_space<vmem>>, vector<1x64x1xf32>
    %24 = vector.shape_cast %23 : vector<1x64x1xf32> to vector<64x1xf32>
    %25 = vector.broadcast %24 : vector<64x1xf32> to vector<64x128xf32>
    %26 = arith.addf %22, %25 : vector<64x128xf32>
    %cst_16 = arith.constant dense<0.000000e+00> : vector<128xf32>
    %27 = vector.multi_reduction <add>, %26, %cst_16 [0] : vector<64x128xf32> to vector<128xf32>
    %28 = vector.shape_cast %27 : vector<128xf32> to vector<1x128xf32>
    %cst_17 = arith.constant 6.400000e+01 : f32
    %29 = vector.broadcast %cst_17 : f32 to vector<1x128xf32>
    %30 = arith.divf %28, %29 : vector<1x128xf32>
    %31 = vector.broadcast %30 : vector<1x128xf32> to vector<64x128xf32>
    %32 = arith.subf %26, %31 : vector<64x128xf32>
    %33 = vector.broadcast %30 : vector<1x128xf32> to vector<64x128xf32>
    %34 = arith.subf %26, %33 : vector<64x128xf32>
    %35 = arith.mulf %32, %34 : vector<64x128xf32>
    %cst_18 = arith.constant dense<0.000000e+00> : vector<128xf32>
    %36 = vector.multi_reduction <add>, %35, %cst_18 [0] : vector<64x128xf32> to vector<128xf32>
    %37 = vector.shape_cast %36 : vector<128xf32> to vector<1x128xf32>
    %cst_19 = arith.constant 6.400000e+01 : f32
    %38 = vector.broadcast %cst_19 : f32 to vector<1x128xf32>
    %39 = arith.divf %37, %38 : vector<1x128xf32>
    %40 = vector.broadcast %30 : vector<1x128xf32> to vector<64x128xf32>
    %41 = arith.subf %26, %40 : vector<64x128xf32>
    %cst_20 = arith.constant 9.99999974E-6 : f32
    %42 = vector.broadcast %cst_20 : f32 to vector<1x128xf32>
    %43 = arith.addf %39, %42 : vector<1x128xf32>
    %44 = math.rsqrt %43 : vector<1x128xf32>
    %45 = vector.broadcast %44 : vector<1x128xf32> to vector<64x128xf32>
    %46 = arith.mulf %41, %45 : vector<64x128xf32>
    %c0_21 = arith.constant 0 : index
    %c0_22 = arith.constant 0 : index
    %c0_23 = arith.constant 0 : index
    %47 = vector.load %arg6[%c0_21, %c0_22, %c0_23] : memref<2x64x1xf32, #tpu.memory_space<vmem>>, vector<1x64x1xf32>
    %48 = vector.shape_cast %47 : vector<1x64x1xf32> to vector<64x1xf32>
    %49 = vector.broadcast %48 : vector<64x1xf32> to vector<64x128xf32>
    %50 = arith.mulf %46, %49 : vector<64x128xf32>
    %c0_24 = arith.constant 0 : index
    %c0_25 = arith.constant 0 : index
    %c0_26 = arith.constant 0 : index
    %51 = vector.load %arg7[%c0_24, %c0_25, %c0_26] : memref<2x64x1xf32, #tpu.memory_space<vmem>>, vector<1x64x1xf32>
    %52 = vector.shape_cast %51 : vector<1x64x1xf32> to vector<64x1xf32>
    %53 = vector.broadcast %52 : vector<64x1xf32> to vector<64x128xf32>
    %54 = arith.addf %50, %53 : vector<64x128xf32>
    %55 = arith.mulf %54, %54 : vector<64x128xf32>
    %56 = arith.mulf %54, %55 : vector<64x128xf32>
    %cst_27 = arith.constant 4.471500e-02 : f32
    %57 = vector.broadcast %cst_27 : f32 to vector<64x128xf32>
    %58 = arith.mulf %57, %56 : vector<64x128xf32>
    %59 = arith.addf %54, %58 : vector<64x128xf32>
    %cst_28 = arith.constant 0.797884583 : f32
    %60 = vector.broadcast %cst_28 : f32 to vector<64x128xf32>
    %61 = arith.mulf %60, %59 : vector<64x128xf32>
    %62 = math.tanh %61 : vector<64x128xf32>
    %cst_29 = arith.constant 1.000000e+00 : f32
    %63 = vector.broadcast %cst_29 : f32 to vector<64x128xf32>
    %64 = arith.addf %63, %62 : vector<64x128xf32>
    %cst_30 = arith.constant 5.000000e-01 : f32
    %65 = vector.broadcast %cst_30 : f32 to vector<64x128xf32>
    %66 = arith.mulf %65, %64 : vector<64x128xf32>
    %67 = arith.mulf %54, %66 : vector<64x128xf32>
    %68 = arith.addf %67, %18 : vector<64x128xf32>
    %c1 = arith.constant 1 : index
    %c0_31 = arith.constant 0 : index
    %c0_32 = arith.constant 0 : index
    %69 = vector.load %arg4[%c1, %c0_31, %c0_32] : memref<2x64x64xbf16, #tpu.memory_space<vmem>>, vector<1x64x64xbf16>
    %70 = vector.shape_cast %69 : vector<1x64x64xbf16> to vector<64x64xbf16>
    %71 = arith.truncf %68 : vector<64x128xf32> to vector<64x128xbf16>
    %cst_33 = arith.constant dense<0.000000e+00> : vector<64x128xf32>
    %72 = tpu.matmul %70, %71, %cst_33 {dimension_numbers = #tpu.dot_dimension_numbers<[1], [0], [0], [1], [0, 0, 1, 1], [], []>} : vector<64x64xbf16>, vector<64x128xbf16>, vector<64x128xf32> -> vector<64x128xf32>
    %c1_34 = arith.constant 1 : index
    %c0_35 = arith.constant 0 : index
    %c0_36 = arith.constant 0 : index
    %73 = vector.load %arg5[%c1_34, %c0_35, %c0_36] : memref<2x64x1xf32, #tpu.memory_space<vmem>>, vector<1x64x1xf32>
    %74 = vector.shape_cast %73 : vector<1x64x1xf32> to vector<64x1xf32>
    %75 = vector.broadcast %74 : vector<64x1xf32> to vector<64x128xf32>
    %76 = arith.addf %72, %75 : vector<64x128xf32>
    %cst_37 = arith.constant dense<0.000000e+00> : vector<128xf32>
    %77 = vector.multi_reduction <add>, %76, %cst_37 [0] : vector<64x128xf32> to vector<128xf32>
    %78 = vector.shape_cast %77 : vector<128xf32> to vector<1x128xf32>
    %cst_38 = arith.constant 6.400000e+01 : f32
    %79 = vector.broadcast %cst_38 : f32 to vector<1x128xf32>
    %80 = arith.divf %78, %79 : vector<1x128xf32>
    %81 = vector.broadcast %80 : vector<1x128xf32> to vector<64x128xf32>
    %82 = arith.subf %76, %81 : vector<64x128xf32>
    %83 = vector.broadcast %80 : vector<1x128xf32> to vector<64x128xf32>
    %84 = arith.subf %76, %83 : vector<64x128xf32>
    %85 = arith.mulf %82, %84 : vector<64x128xf32>
    %cst_39 = arith.constant dense<0.000000e+00> : vector<128xf32>
    %86 = vector.multi_reduction <add>, %85, %cst_39 [0] : vector<64x128xf32> to vector<128xf32>
    %87 = vector.shape_cast %86 : vector<128xf32> to vector<1x128xf32>
    %cst_40 = arith.constant 6.400000e+01 : f32
    %88 = vector.broadcast %cst_40 : f32 to vector<1x128xf32>
    %89 = arith.divf %87, %88 : vector<1x128xf32>
    %90 = vector.broadcast %80 : vector<1x128xf32> to vector<64x128xf32>
    %91 = arith.subf %76, %90 : vector<64x128xf32>
    %cst_41 = arith.constant 9.99999974E-6 : f32
    %92 = vector.broadcast %cst_41 : f32 to vector<1x128xf32>
    %93 = arith.addf %89, %92 : vector<1x128xf32>
    %94 = math.rsqrt %93 : vector<1x128xf32>
    %95 = vector.broadcast %94 : vector<1x128xf32> to vector<64x128xf32>
    %96 = arith.mulf %91, %95 : vector<64x128xf32>
    %c1_42 = arith.constant 1 : index
    %c0_43 = arith.constant 0 : index
    %c0_44 = arith.constant 0 : index
    %97 = vector.load %arg6[%c1_42, %c0_43, %c0_44] : memref<2x64x1xf32, #tpu.memory_space<vmem>>, vector<1x64x1xf32>
    %98 = vector.shape_cast %97 : vector<1x64x1xf32> to vector<64x1xf32>
    %99 = vector.broadcast %98 : vector<64x1xf32> to vector<64x128xf32>
    %100 = arith.mulf %96, %99 : vector<64x128xf32>
    %c1_45 = arith.constant 1 : index
    %c0_46 = arith.constant 0 : index
    %c0_47 = arith.constant 0 : index
    %101 = vector.load %arg7[%c1_45, %c0_46, %c0_47] : memref<2x64x1xf32, #tpu.memory_space<vmem>>, vector<1x64x1xf32>
    %102 = vector.shape_cast %101 : vector<1x64x1xf32> to vector<64x1xf32>
    %103 = vector.broadcast %102 : vector<64x1xf32> to vector<64x128xf32>
    %104 = arith.addf %100, %103 : vector<64x128xf32>
    %105 = arith.mulf %104, %104 : vector<64x128xf32>
    %106 = arith.mulf %104, %105 : vector<64x128xf32>
    %cst_48 = arith.constant 4.471500e-02 : f32
    %107 = vector.broadcast %cst_48 : f32 to vector<64x128xf32>
    %108 = arith.mulf %107, %106 : vector<64x128xf32>
    %109 = arith.addf %104, %108 : vector<64x128xf32>
    %cst_49 = arith.constant 0.797884583 : f32
    %110 = vector.broadcast %cst_49 : f32 to vector<64x128xf32>
    %111 = arith.mulf %110, %109 : vector<64x128xf32>
    %112 = math.tanh %111 : vector<64x128xf32>
    %cst_50 = arith.constant 1.000000e+00 : f32
    %113 = vector.broadcast %cst_50 : f32 to vector<64x128xf32>
    %114 = arith.addf %113, %112 : vector<64x128xf32>
    %cst_51 = arith.constant 5.000000e-01 : f32
    %115 = vector.broadcast %cst_51 : f32 to vector<64x128xf32>
    %116 = arith.mulf %115, %114 : vector<64x128xf32>
    %117 = arith.mulf %104, %116 : vector<64x128xf32>
    %118 = arith.addf %117, %68 : vector<64x128xf32>
    %c0_52 = arith.constant 0 : index
    %c0_53 = arith.constant 0 : index
    %119 = vector.load %arg8[%c0_52, %c0_53] : memref<64x1xf32, #tpu.memory_space<vmem>>, vector<64x1xf32>
    %120 = vector.broadcast %119 : vector<64x1xf32> to vector<64x128xf32>
    %121 = arith.mulf %118, %120 : vector<64x128xf32>
    %cst_54 = arith.constant dense<0.000000e+00> : vector<128xf32>
    %122 = vector.multi_reduction <add>, %121, %cst_54 [0] : vector<64x128xf32> to vector<128xf32>
    %123 = vector.shape_cast %122 : vector<128xf32> to vector<1x128xf32>
    %c0_55 = arith.constant 0 : index
    %c0_56 = arith.constant 0 : index
    %124 = vector.load %arg9[%c0_55, %c0_56] : memref<1x1xf32, #tpu.memory_space<vmem>>, vector<1x1xf32>
    %125 = vector.broadcast %124 : vector<1x1xf32> to vector<1x128xf32>
    %126 = arith.addf %123, %125 : vector<1x128xf32>
    %c0_57 = arith.constant 0 : index
    %c0_58 = arith.constant 0 : index
    %127 = vector.load %arg10[%c0_57, %c0_58] : memref<1x128xf32, #tpu.memory_space<vmem>>, vector<1x128xf32>
    tpu.vector_store %arg10[%c0_57, %c0_58], %126 {strides = array<i32>} : memref<1x128xf32, #tpu.memory_space<vmem>>, vector<1x128xf32>,
    return
  }
  func.func @transform_0(%arg0: i32) -> (i32, i32) {
    %c0_i32 = arith.constant 0 : i32
    %c0_i32_0 = arith.constant 0 : i32
    return %c0_i32, %arg0 : i32, i32
  }
  func.func @transform_1(%arg0: i32) -> (i32, i32) {
    %c0_i32 = arith.constant 0 : i32
    %c0_i32_0 = arith.constant 0 : i32
    %c0_i32_1 = arith.constant 0 : i32
    return %c0_i32, %c0_i32_0 : i32, i32
  }
  func.func @transform_2(%arg0: i32) -> (i32, i32) {
    %c0_i32 = arith.constant 0 : i32
    %c0_i32_0 = arith.constant 0 : i32
    %c0_i32_1 = arith.constant 0 : i32
    return %c0_i32, %c0_i32_0 : i32, i32
  }
  func.func @transform_3(%arg0: i32) -> (i32, i32, i32) {
    %c0_i32 = arith.constant 0 : i32
    %c0_i32_0 = arith.constant 0 : i32
    %c0_i32_1 = arith.constant 0 : i32
    %c0_i32_2 = arith.constant 0 : i32
    return %c0_i32, %c0_i32_0, %c0_i32_1 : i32, i32, i32
  }
  func.func @transform_4(%arg0: i32) -> (i32, i32, i32) {
    %c0_i32 = arith.constant 0 : i32
    %c0_i32_0 = arith.constant 0 : i32
    %c0_i32_1 = arith.constant 0 : i32
    %c0_i32_2 = arith.constant 0 : i32
    return %c0_i32, %c0_i32_0, %c0_i32_1 : i32, i32, i32
  }
  func.func @transform_5(%arg0: i32) -> (i32, i32, i32) {
    %c0_i32 = arith.constant 0 : i32
    %c0_i32_0 = arith.constant 0 : i32
    %c0_i32_1 = arith.constant 0 : i32
    %c0_i32_2 = arith.constant 0 : i32
    return %c0_i32, %c0_i32_0, %c0_i32_1 : i32, i32, i32
  }
  func.func @transform_6(%arg0: i32) -> (i32, i32, i32) {
    %c0_i32 = arith.constant 0 : i32
    %c0_i32_0 = arith.constant 0 : i32
    %c0_i32_1 = arith.constant 0 : i32
    %c0_i32_2 = arith.constant 0 : i32
    return %c0_i32, %c0_i32_0, %c0_i32_1 : i32, i32, i32
  }
  func.func @transform_7(%arg0: i32) -> (i32, i32) {
    %c0_i32 = arith.constant 0 : i32
    %c0_i32_0 = arith.constant 0 : i32
    %c0_i32_1 = arith.constant 0 : i32
    return %c0_i32, %c0_i32_0 : i32, i32
  }
  func.func @transform_8(%arg0: i32) -> (i32, i32) {
    %c0_i32 = arith.constant 0 : i32
    %c0_i32_0 = arith.constant 0 : i32
    %c0_i32_1 = arith.constant 0 : i32
    return %c0_i32, %c0_i32_0 : i32, i32
  }
  func.func @transform_9(%arg0: i32) -> (i32, i32) {
    %c0_i32 = arith.constant 0 : i32
    %c0_i32_0 = arith.constant 0 : i32
    return %c0_i32, %arg0 : i32, i32
  }
}

</mosaic_0001>

<bundles_post_ra>
// kernel: tpu_custom_call.1
= control target key start
LH: loop header
LB: loop body
LE: loop exit
PB: predicated region body
PF: predicated region fallthrough
CT: control target
= control target key end

     0   :  { %s1844_s0 = inlined_call_operand.vmem [shape: bf16[32,128], index: 0, kind: input, shape index: {}]   ;;  %s1845_s1 = inlined_call_operand.vmem [shape: bf16[64,32], index: 1, kind: input, shape index: {}]   ;;  %s1846_s2 = inlined_call_operand.vmem [shape: f32[64,1], index: 2, kind: input, shape index: {}]   ;;  %s1847_s3 = inlined_call_operand.vmem [shape: bf16[2,64,64], index: 3, kind: input, shape index: {}]   ;;  %s1848_s4 = inlined_call_operand.vmem [shape: f32[2,64,1], index: 4, kind: input, shape index: {}]   ;;  %s1849_s5 = inlined_call_operand.vmem [shape: f32[2,64,1], index: 5, kind: input, shape index: {}]   ;;  %s1850_s6 = inlined_call_operand.vmem [shape: f32[2,64,1], index: 6, kind: input, shape index: {}]   ;;  %s1851_s7 = inlined_call_operand.vmem [shape: f32[64,1], index: 7, kind: input, shape index: {}]   ;;  %s1852_s8 = inlined_call_operand.<no memory space> [shape: f32[1,1], index: 8, kind: input, shape index: {}]   ;;  %s1853_s9 = inlined_call_operand.hbm [shape: f32[1,128], index: 9, kind: output, shape index: {}]  }
   0x1   :  { %v14_v0 = vstv %s1852_s8 }
   0x2   :  { %15 = vst [vmem:[#allocation2] sm:$0x1] %v14_v0 }
   0x3   :  { %v54_v1 = vld [vmem:[%s1846_s2 + $0x30] sm:$0xff]  ;;  %v52_v2 = vld [vmem:[%s1846_s2 + $0x20] sm:$0xff]  ;;  %v1308_v4 = vmov 0   ;;  %v1201_v5 = vld [vmem:[%s1844_s0 + $0x8] sm:$0xff] }
   0x4   :  { %v50_v3 = vld [vmem:[%s1846_s2 + $0x10] sm:$0xff]  ;;  %1227 = vset.pattern.permute.xlu2 %v1308_v4  ;;  %1226 = vset.pattern.permute.xlu1 %v1308_v4  ;;  %v1200_v6 = vld [vmem:[%s1844_s0] sm:$0xff] }
   0x5   :  { %1225 = vset.pattern.permute.xlu0 %v1308_v4  ;;  %78 = vperm.xlu1 %1226, %v52_v2  }
   0x6   :  { %88 = vperm.xlu0 %1225, %v54_v1   ;;  %68 = vperm.xlu2 %1227, %v50_v3  }
   0x7   :  { %147 = vmatpush.bf16.msra.mxu0 %v1201_v5 }
   0x8   :  { %16 = vsyncpa [#allocation4], 0  ;;  %v53_v7 = vld [vmem:[%s1846_s2 + $0x28] sm:$0xff]  ;;  %v55_v8 = vld [vmem:[%s1846_s2 + $0x38] sm:$0xff]  ;;  %vm128_vm0 = vcmask 261120   ;;  %vm322_vm1 = vcmask 523264  }
   0x9   :  { %v51_v9 = vld [vmem:[%s1846_s2 + $0x18] sm:$0xff]  ;;  %v1202_v10 = vld [vmem:[%s1845_s1] sm:$0xff]  ;;  %v49_v11 = vld [vmem:[%s1846_s2 + $0x8] sm:$0xff] }
   0xa   :  { %v254_v12 = vld [vmem:[%s1848_s4] sm:$0xff]  ;;  %v256_v14 = vld [vmem:[%s1848_s4 + $0x10] sm:$0xff]  ;;  %v257_v15 = vld [vmem:[%s1848_s4 + $0x18] sm:$0xff] }
   0xb   :  { %148 = vmatpush.bf16.msra.mxu0 %v1200_v6  ;;  %v48_v13 = vld [vmem:[%s1846_s2] sm:$0xff]  ;;  %v255_v16 = vld [vmem:[%s1848_s4 + $0x8] sm:$0xff]  ;;  %v260_v19 = vld [vmem:[%s1848_s4 + $0x30] sm:$0xff] }
   0xc   :  { %v1203_v17 = vld [vmem:[%s1845_s1 + $0x8] sm:$0xff]  ;;  %v258_v20 = vld [vmem:[%s1848_s4 + $0x20] sm:$0xff]  ;;  %v440_v21 = vld [vmem:[%s1849_s5 + $0x30] sm:$0xff] }
   0xd   :  { %83 = vperm.xlu1 %1226, %v53_v7   ;;  %v259_v18 = vld [vmem:[%s1848_s4 + $0x28] sm:$0xff]  ;;  %v441_v22 = vld [vmem:[%s1849_s5 + $0x38] sm:$0xff]  ;;  %v1204_v24 = vld [vmem:[%s1845_s1 + $0x10] sm:$0xff] }
   0xe   :  { %93 = vperm.xlu0 %1225, %v55_v8   ;;  %73 = vperm.xlu2 %1227, %v51_v9   ;;  %v261_v23 = vld [vmem:[%s1848_s4 + $0x38] sm:$0xff]  ;;  %v438_v26 = vld [vmem:[%s1849_s5 + $0x20] sm:$0xff]  ;;  %v496_v27 = vld [vmem:[%s1850_s6 + $0x30] sm:$0xff] }
   0xf   :  { %1124 = vmatmul.msk.bf16.vlgmr.msra.gmra.mxu0 %vm128_vm0, %v1202_v10  ;;  %v497_v25 = vld [vmem:[%s1850_s6 + $0x38] sm:$0xff]  ;;  %v494_v28 = vld [vmem:[%s1850_s6 + $0x20] sm:$0xff]  ;;  %v495_v29 = vld [vmem:[%s1850_s6 + $0x28] sm:$0xff] }
  0x10   :  { %v439_v30 = vld [vmem:[%s1849_s5 + $0x28] sm:$0xff]  ;;  %v1205_v31 = vld [vmem:[%s1845_s1 + $0x18] sm:$0xff]  ;;  %v492_v33 = vld [vmem:[%s1850_s6 + $0x10] sm:$0xff] }
  0x11   :  { %v437_v32 = vld [vmem:[%s1849_s5 + $0x18] sm:$0xff]  ;;  %v436_v34 = vld [vmem:[%s1849_s5 + $0x10] sm:$0xff]  ;;  %v434_v35 = vld [vmem:[%s1849_s5] sm:$0xff] }
  0x12   :  { %v435_v36 = vld [vmem:[%s1849_s5 + $0x8] sm:$0xff]  ;;  %v493_v37 = vld [vmem:[%s1850_s6 + $0x18] sm:$0xff]  ;;  %v1156_v39 = vld [vmem:[%s1848_s4 + $0x40] sm:$0xff] }
  0x13   :  { %v491_v38 = vld [vmem:[%s1850_s6 + $0x8] sm:$0xff]  ;;  %v490_v40 = vld [vmem:[%s1850_s6] sm:$0xff]  ;;  %v1158_v41 = vld [vmem:[%s1848_s4 + $0x50] sm:$0xff] }
  0x14   :  { %v1159_v42 = vld [vmem:[%s1848_s4 + $0x58] sm:$0xff]  ;;  %v1157_v43 = vld [vmem:[%s1848_s4 + $0x48] sm:$0xff]  ;;  %v1162_v45 = vld [vmem:[%s1848_s4 + $0x70] sm:$0xff] }
  0x15   :  { %63 = vperm.xlu1 %1226, %v49_v11   ;;  %v1161_v44 = vld [vmem:[%s1848_s4 + $0x68] sm:$0xff]  ;;  %v1160_v46 = vld [vmem:[%s1848_s4 + $0x60] sm:$0xff]  ;;  %v1163_v49 = vld [vmem:[%s1848_s4 + $0x78] sm:$0xff]  ;;  %s1091_s4 = sshll.u32 %s1853_s9, 4  ;;  %s1092_s4 = int_to_ptr.hbm [resolvable:$true] %s1091_s4 }
  0x16   :  { %264 = vperm.xlu2 %1227, %v254_v12   ;;  %58 = vperm.xlu0 %1225, %v48_v13   ;;  %v1184_v47 = vld [vmem:[%s1849_s5 + $0x40] sm:$0xff]  ;;  %v1185_v48 = vld [vmem:[%s1849_s5 + $0x48] sm:$0xff]  ;;  %v1187_v50 = vld [vmem:[%s1849_s5 + $0x58] sm:$0xff] }
  0x17   :  { %v1188_v51 = vld [vmem:[%s1849_s5 + $0x60] sm:$0xff]  ;;  %v1186_v52 = vld [vmem:[%s1849_s5 + $0x50] sm:$0xff]  ;;  %v1191_v54 = vld [vmem:[%s1849_s5 + $0x78] sm:$0xff] }
  0x18   :  { %v1190_v53 = vld [vmem:[%s1849_s5 + $0x70] sm:$0xff]  ;;  %v1189_v55 = vld [vmem:[%s1849_s5 + $0x68] sm:$0xff]  ;;  %v1192_v58 = vld [vmem:[%s1850_s6 + $0x40] sm:$0xff] }
  0x19   :  { %v1193_v56 = vld [vmem:[%s1850_s6 + $0x48] sm:$0xff]  ;;  %v1194_v57 = vld [vmem:[%s1850_s6 + $0x50] sm:$0xff]  ;;  %v1196_v59 = vld [vmem:[%s1850_s6 + $0x60] sm:$0xff] }
  0x1a   :  { %v1197_v60 = vld [vmem:[%s1850_s6 + $0x68] sm:$0xff]  ;;  %v1195_v61 = vld [vmem:[%s1850_s6 + $0x58] sm:$0xff]  ;;  %v1006_v0 = vld [vmem:[%s1851_s7] sm:$0xff] }
  0x1b   :  { %v1199_v63 = vld [vmem:[%s1850_s6 + $0x78] sm:$0xff]  ;;  %v1198_v1 = vld [vmem:[%s1850_s6 + $0x70] sm:$0xff]  ;;  %v1007_v5 = vld [vmem:[%s1851_s7 + $0x8] sm:$0xff] }
  0x1c   :  { %v1008_v3 = vld [vmem:[%s1851_s7 + $0x10] sm:$0xff]  ;;  %v1009_v4 = vld [vmem:[%s1851_s7 + $0x18] sm:$0xff]  ;;  %v1011_v7 = vld [vmem:[%s1851_s7 + $0x28] sm:$0xff] }
  0x1d   :  { %274 = vperm.xlu1 %1226, %v256_v14   ;;  %v1012_v8 = vld [vmem:[%s1851_s7 + $0x30] sm:$0xff]  ;;  %v1010_v9 = vld [vmem:[%s1851_s7 + $0x20] sm:$0xff]  ;;  %v1013_v14 = vld [vmem:[%s1851_s7 + $0x38] sm:$0xff] }
  0x1e   :  { %279 = vperm.xlu2 %1227, %v257_v15   ;;  %269 = vperm.xlu0 %1225, %v255_v16   ;;  %v1075_v13 = vld [vmem:[#allocation2] sm:$0x1] }
  0x1f   :  { %1125 = vmatmul.msk.bf16.gmra.mxu0 %vm128_vm0, %v1203_v17 }
  0x25   :  { %289 = vperm.xlu1 %1226, %v259_v18  }
  0x26   :  { %294 = vperm.xlu2 %1227, %v260_v19   ;;  %284 = vperm.xlu0 %1225, %v258_v20  }
  0x2d   :  { %474 = vperm.xlu1 %1226, %v440_v21  }
  0x2e   :  { %479 = vperm.xlu2 %1227, %v441_v22   ;;  %299 = vperm.xlu0 %1225, %v261_v23  }
  0x2f   :  { %1126 = vmatmul.msk.bf16.gmra.mxu0 %vm128_vm0, %v1204_v24 }
  0x35   :  { %535 = vperm.xlu1 %1226, %v497_v25  }
  0x36   :  { %464 = vperm.xlu2 %1227, %v438_v26   ;;  %530 = vperm.xlu0 %1225, %v496_v27  }
  0x3d   :  { %520 = vperm.xlu1 %1226, %v494_v28  }
  0x3e   :  { %525 = vperm.xlu2 %1227, %v495_v29   ;;  %469 = vperm.xlu0 %1225, %v439_v30  }
  0x3f   :  { %1127 = vmatmul.msk.bf16.gmra.mxu0 %vm128_vm0, %v1205_v31 }
  0x45   :  { %459 = vperm.xlu1 %1226, %v437_v32  }
  0x46   :  { %510 = vperm.xlu2 %1227, %v492_v33   ;;  %454 = vperm.xlu0 %1225, %v436_v34  }
  0x4d   :  { %444 = vperm.xlu1 %1226, %v434_v35  }
  0x4e   :  { %449 = vperm.xlu2 %1227, %v435_v36   ;;  %515 = vperm.xlu0 %1225, %v493_v37  }
  0x55   :  { %505 = vperm.xlu1 %1226, %v491_v38  }
  0x56   :  { %650 = vperm.xlu2 %1227, %v1156_v39   ;;  %500 = vperm.xlu0 %1225, %v490_v40  }
  0x5d   :  { %660 = vperm.xlu1 %1226, %v1158_v41  }
  0x5e   :  { %665 = vperm.xlu2 %1227, %v1159_v42   ;;  %655 = vperm.xlu0 %1225, %v1157_v43  }
  0x60   :  { %v69_v16 = vpop.permute.xlu2 %68 }
  0x65   :  { %675 = vperm.xlu1 %1226, %v1161_v44  }
  0x66   :  { %680 = vperm.xlu2 %1227, %v1162_v45   ;;  %670 = vperm.xlu0 %1225, %v1160_v46  }
  0x68   :  { %v74_v21 = vpop.permute.xlu2 %73 }
  0x6d   :  { %823 = vperm.xlu1 %1226, %v1184_v47  }
  0x6e   :  { %828 = vperm.xlu2 %1227, %v1185_v48   ;;  %685 = vperm.xlu0 %1225, %v1163_v49  }
  0x75   :  { %838 = vperm.xlu1 %1226, %v1187_v50  }
  0x76   :  { %843 = vperm.xlu2 %1227, %v1188_v51   ;;  %833 = vperm.xlu0 %1225, %v1186_v52  }
  0x77   :  { %v79_v11 = vpop.permute.xlu1 %78 }
  0x78   :  { %v89_v12 = vpop.permute.xlu0 %88 }
  0x7d   :  { %853 = vperm.xlu1 %1226, %v1190_v53  }
  0x7e   :  { %858 = vperm.xlu2 %1227, %v1191_v54   ;;  %848 = vperm.xlu0 %1225, %v1189_v55  }
  0x7f   :  { %v84_v17 = vpop.permute.xlu1 %83 }
  0x80   :  { %v94_v18 = vpop.permute.xlu0 %93 }
  0x85   :  { %885 = vperm.xlu1 %1226, %v1193_v56  }
  0x86   :  { %890 = vperm.xlu2 %1227, %v1194_v57   ;;  %880 = vperm.xlu0 %1225, %v1192_v58  }
  0x87   :  { %v64_v27 = vpop.permute.xlu1 %63 }
  0x88   :  { %v59_v30 = vpop.permute.xlu0 %58 }
  0x8c   :  { %v150_v62 = vpop.f32.mrf.mxu0 }
  0x8d   :  { %900 = vperm.xlu1 %1226, %v1196_v59   ;;  %v1597_v34 = vadd.f32 %v150_v62, %v59_v30 }
  0x8e   :  { %905 = vperm.xlu2 %1227, %v1197_v60   ;;  %895 = vperm.xlu0 %1225, %v1195_v61  }
  0x8f   :  { %v170_v42 = vmul.f32 %v1597_v34, %v1597_v34 }
  0x91   :  { %v178_v52 = vmul.f32 %v170_v42, %v1597_v34 }
  0x93   :  { %v186_v61 = vmul.f32 0.044715, %v178_v52  ;;  %v265_v52 = vpop.permute.xlu2 %264 }
  0x94   :  { %v152_v2 = vpop.f32.mrf.mxu0 }
  0x95   :  { %915 = vperm.xlu1 %1226, %v1199_v63   ;;  %v1592_v31 = vadd.f32 %v152_v2, %v64_v27 }
  0x96   :  { %1016 = vperm.xlu2 %1227, %v1006_v0   ;;  %910 = vperm.xlu0 %1225, %v1198_v1  }
  0x97   :  { %v171_v39 = vmul.f32 %v1592_v31, %v1592_v31 }
  0x99   :  { %v179_v48 = vmul.f32 %v171_v39, %v1592_v31 }
  0x9b   :  { %v187_v58 = vmul.f32 0.044715, %v179_v48  ;;  %v1207_v48 = vld [vmem:[%s1847_s3 + $0x8] sm:$0xff] }
  0x9c   :  { %v155_v6 = vpop.f32.mrf.mxu0 }
  0x9d   :  { %1026 = vperm.xlu1 %1226, %v1008_v3   ;;  %v1586_v25 = vadd.f32 %v155_v6, %v69_v16  ;;  %v195_v2 = vadd.f32 %v187_v58, %v1592_v31 }
  0x9e   :  { %1031 = vperm.xlu2 %1227, %v1009_v4   ;;  %1021 = vperm.xlu0 %1225, %v1007_v5   ;;  %v194_v4 = vadd.f32 %v186_v61, %v1597_v34 }
  0x9f   :  { %v172_v35 = vmul.f32 %v1586_v25, %v1586_v25 }
  0xa1   :  { %v180_v43 = vmul.f32 %v172_v35, %v1586_v25 }
  0xa3   :  { %v188_v53 = vmul.f32 0.044715, %v180_v43 }
  0xa4   :  { %v157_v10 = vpop.f32.mrf.mxu0 }
  0xa5   :  { %1041 = vperm.xlu1 %1226, %v1011_v7   ;;  %v1582_v23 = vadd.f32 %v157_v10, %v74_v21  ;;  %v196_v62 = vadd.f32 %v188_v53, %v1586_v25  ;;  %v202_v10 = vmul.f32 0.7978846, %v194_v4 }
  0xa6   :  { %1046 = vperm.xlu2 %1227, %v1012_v8   ;;  %1036 = vperm.xlu0 %1225, %v1010_v9   ;;  %v203_v8 = vmul.f32 0.7978846, %v195_v2 }
  0xa7   :  { %v173_v28 = vmul.f32 %v1582_v23, %v1582_v23  ;;  %v204_v6 = vmul.f32 0.7978846, %v196_v62  ;;  %v1309_v62 = vmov 64.0  }
  0xa9   :  { %v181_v38 = vmul.f32 %v173_v28, %v1582_v23 }
  0xab   :  { %v189_v46 = vmul.f32 0.044715, %v181_v38 }
  0xac   :  { %v160_v15 = vpop.f32.mrf.mxu0 }
  0xad   :  { %1078 = vperm.xlu1 %1226, %v1075_v13   ;;  %v1580_v22 = vadd.f32 %v160_v15, %v79_v11  ;;  %v197_v57 = vadd.f32 %v189_v46, %v1582_v23 }
  0xae   :  { %1051 = vperm.xlu0 %1225, %v1013_v14  }
  0xaf   :  { %v174_v26 = vmul.f32 %v1580_v22, %v1580_v22  ;;  %v205_v1 = vmul.f32 0.7978846, %v197_v57 }
  0xb1   :  { %v182_v36 = vmul.f32 %v174_v26, %v1580_v22 }
  0xb3   :  { %v190_v44 = vmul.f32 0.044715, %v182_v36 }
  0xb4   :  { %v162_v19 = vpop.f32.mrf.mxu0 }
  0xb5   :  { %v1578_v20 = vadd.f32 %v162_v19, %v84_v17  ;;  %v198_v54 = vadd.f32 %v190_v44, %v1580_v22 }
  0xb7   :  { %v175_v24 = vmul.f32 %v1578_v20, %v1578_v20  ;;  %v206_v0 = vmul.f32 0.7978846, %v198_v54  ;;  %v270_v54 = vpop.permute.xlu0 %269 }
  0xb9   :  { %v183_v32 = vmul.f32 %v175_v24, %v1578_v20 }
  0xbb   :  { %v191_v40 = vmul.f32 0.044715, %v183_v32 }
  0xbc   :  { %v165_v29 = vpop.f32.mrf.mxu0 }
  0xbd   :  { %v1595_v33 = vadd.f32 %v165_v29, %v89_v12  ;;  %v199_v49 = vadd.f32 %v191_v40, %v1578_v20 }
  0xbf   :  { %v176_v37 = vmul.f32 %v1595_v33, %v1595_v33  ;;  %v207_v60 = vmul.f32 0.7978846, %v199_v49 }
  0xc1   :  { %v184_v41 = vmul.f32 %v176_v37, %v1595_v33 }
  0xc3   :  { %v192_v45 = vmul.f32 0.044715, %v184_v41 }
  0xc4   :  { %v167_v47 = vpop.f32.mrf.mxu0 }
  0xc5   :  { %v200_v50 = vadd.f32 %v192_v45, %v1595_v33  ;;  %v168_v51 = vadd.f32 %v167_v47, %v94_v18 }
  0xc7   :  { %v177_v55 = vmul.f32 %v168_v51, %v168_v51  ;;  %v208_v56 = vmul.f32 0.7978846, %v200_v50 }
  0xc9   :  { %v185_v59 = vmul.f32 %v177_v55, %v168_v51  ;;  %1228 = vtanh.f32 %v208_v56  ;;  %v275_v56 = vpop.permute.xlu1 %274 }
  0xca   :  { %1230 = vtanh.f32 %v207_v60 }
  0xcb   :  { %v193_v63 = vmul.f32 0.044715, %v185_v59  ;;  %1232 = vtanh.f32 %v206_v0  ;;  %v280_v59 = vpop.permute.xlu2 %279 }
  0xcc   :  { %1234 = vtanh.f32 %v205_v1 }
  0xcd   :  { %v201_v3 = vadd.f32 %v193_v63, %v168_v51  ;;  %v285_v63 = vpop.permute.xlu0 %284 }
  0xcf   :  { %v209_v5 = vmul.f32 0.7978846, %v201_v3  ;;  %v1229_v7 = vpop.eup %1228 }
  0xd0   :  { %v1231_v9 = vpop.eup %1230  ;;  %v224_v11 = vadd.f32 1.0, %v1229_v7 }
  0xd1   :  { %1236 = vtanh.f32 %v209_v5  ;;  %v1233_v12 = vpop.eup %1232  ;;  %v223_v14 = vadd.f32 1.0, %v1231_v9  ;;  %v290_v5 = vpop.permute.xlu1 %289 }
  0xd2   :  { %1238 = vtanh.f32 %v204_v6  ;;  %v1235_v13 = vpop.eup %1234  ;;  %v232_v17 = vmul.f32 0.5, %v224_v11  ;;  %v222_v18 = vadd.f32 1.0, %v1233_v12 }
  0xd3   :  { %1240 = vtanh.f32 %v203_v8  ;;  %v231_v24 = vmul.f32 0.5, %v223_v14  ;;  %v221_v26 = vadd.f32 1.0, %v1235_v13  ;;  %v295_v9 = vpop.permute.xlu2 %294 }
  0xd4   :  { %1242 = vtanh.f32 %v202_v10  ;;  %v1621_v28 = vmul.f32 %v232_v17, %v1595_v33  ;;  %v230_v30 = vmul.f32 0.5, %v222_v18 }
  0xd5   :  { %v1628_v37 = vmul.f32 %v231_v24, %v1578_v20  ;;  %v229_v38 = vmul.f32 0.5, %v221_v26  ;;  %1244 = vrcp.f32 %v1309_v62  ;;  %v300_v14 = vpop.permute.xlu0 %299 }
  0xd6   :  { %v1631_v40 = vmul.f32 %v230_v30, %v1580_v22 }
  0xd7   :  { %v1237_v15 = vpop.eup %1236  ;;  %v1636_v43 = vmul.f32 %v229_v38, %v1582_v23 }
  0xd8   :  { %v225_v16 = vadd.f32 1.0, %v1237_v15  ;;  %v1239_v19 = vpop.eup %1238  ;;  %v252_v42 = vpack.c.bf16 %v1628_v37, %v1631_v40 }
  0xd9   :  { %v1241_v27 = vpop.eup %1240  ;;  %v220_v32 = vadd.f32 1.0, %v1239_v19 }
  0xda   :  { %v233_v21 = vmul.f32 0.5, %v225_v16  ;;  %v1243_v35 = vpop.eup %1242  ;;  %v219_v39 = vadd.f32 1.0, %v1241_v27 }
  0xdb   :  { %v228_v33 = vmul.f32 0.5, %v220_v32  ;;  %v218_v41 = vadd.f32 1.0, %v1243_v35  ;;  %v1245_v6 = vpop.eup %1244 }
  0xdc   :  { %v1623_v29 = vmul.f32 %v233_v21, %v168_v51  ;;  %v227_v44 = vmul.f32 0.5, %v219_v39  ;;  %v378_v12 = vmul.f32 64.0, %v1245_v6  ;;  %vm382_vm2 = vweird.f32 %v1245_v6 }
  0xdd   :  { %v1639_v20 = vmul.f32 %v228_v33, %v1586_v25  ;;  %v226_v45 = vmul.f32 0.5, %v218_v41  ;;  %v1206_v25 = vld [vmem:[%s1847_s3] sm:$0xff] }
  0xde   :  { %v253_v36 = vpack.c.bf16 %v1623_v29, %v1621_v28  ;;  %v1644_v22 = vmul.f32 %v227_v44, %v1592_v31  ;;  %v1208_v31 = vld [vmem:[%s1847_s3 + $0x10] sm:$0xff]  ;;  %v379_v18 = vsub.f32 1.0, %v378_v12 }
  0xdf   :  { %v251_v46 = vpack.c.bf16 %v1636_v43, %v1639_v20  ;;  %v1647_v47 = vmul.f32 %v226_v45, %v1597_v34  ;;  %v1209_v34 = vld [vmem:[%s1847_s3 + $0x18] sm:$0xff] }
  0xe0   :  { %339 = vmatpush.bf16.msra.mxu1 %v253_v36  ;;  %1214 = vmatpush.bf16.msra.mxu3 %v253_v36  ;;  %v380_v24 = vmul.f32 %v1245_v6, %v379_v18 }
  0xe1   :  { %v250_v23 = vpack.c.bf16 %v1644_v22, %v1647_v47 }
  0xe2   :  { %v381_v30 = vadd.f32 %v1245_v6, %v380_v24 }
  0xe4   :  { %340 = vmatpush.bf16.msra.mxu1 %v252_v42  ;;  %1215 = vmatpush.bf16.msra.mxu3 %v252_v42  ;;  %v1667_v36 = vsel %vm382_vm2, %v1245_v6, %v381_v30 }
  0xe8   :  { %341 = vmatpush.bf16.msra.mxu1 %v251_v46  ;;  %1216 = vmatpush.bf16.msra.mxu3 %v251_v46 }
  0xec   :  { %342 = vmatpush.bf16.msra.mxu1 %v250_v23  ;;  %1217 = vmatpush.bf16.msra.mxu3 %v250_v23 }
  0xef   :  { %1144 = vmatmul.msk.bf16.vlgmr.msra.gmra.mxu1 %vm322_vm1, %v1206_v25  ;;  %1145 = vmatmul.msk.bf16.vlgmr.msra.gmra.mxu3 %vm322_vm1, %v1207_v48 }
  0xff   :  { %1146 = vmatmul.msk.bf16.gmra.mxu3 %vm322_vm1, %v1208_v31  ;;  %v475_v31 = vpop.permute.xlu1 %474 }
 0x107   :  { %v536_v62 = vpop.permute.xlu1 %535 }
 0x10f   :  { %1147 = vmatmul.msk.bf16.gmra.mxu3 %vm322_vm1, %v1209_v34  ;;  %v521_v6 = vpop.permute.xlu1 %520 }
 0x16c   :  { %v344_v51 = vpop.f32.mrf.mxu1 }
 0x16d   :  { %v345_v60 = vadd.f32 %v344_v51, %v265_v52 }
 0x172   :  { %v349_v49 = vpop.f32.mrf.mxu3 }
 0x173   :  { %v350_v0 = vadd.f32 %v349_v49, %v275_v56 }
 0x174   :  { %v346_v55 = vpop.f32.mrf.mxu1 }
 0x175   :  { %v347_v58 = vadd.f32 %v346_v55, %v270_v54 }
 0x177   :  { %v364_v61 = vadd.f32 %v347_v58, %v345_v60 }
 0x179   :  { %v365_v3 = vadd.f32 %v364_v61, %v350_v0 }
 0x17a   :  { %v351_v50 = vpop.f32.mrf.mxu3 }
 0x17b   :  { %v352_v1 = vadd.f32 %v351_v50, %v280_v59 }
 0x17d   :  { %v366_v7 = vadd.f32 %v365_v3, %v352_v1 }
 0x182   :  { %v354_v53 = vpop.f32.mrf.mxu3 }
 0x183   :  { %v355_v4 = vadd.f32 %v354_v53, %v285_v63  ;;  %v531_v63 = vpop.permute.xlu0 %530 }
 0x185   :  { %v367_v10 = vadd.f32 %v366_v7, %v355_v4 }
 0x18a   :  { %v356_v57 = vpop.f32.mrf.mxu3 }
 0x18b   :  { %v357_v8 = vadd.f32 %v356_v57, %v290_v5  ;;  %v470_v7 = vpop.permute.xlu0 %469 }
 0x18d   :  { %v368_v13 = vadd.f32 %v367_v10, %v357_v8 }
 0x192   :  { %v359_v2 = vpop.f32.mrf.mxu3 }
 0x193   :  { %v360_v11 = vadd.f32 %v359_v2, %v295_v9 }
 0x195   :  { %v369_v16 = vadd.f32 %v368_v13, %v360_v11  ;;  %v460_v13 = vpop.permute.xlu1 %459 }
 0x19a   :  { %v361_v15 = vpop.f32.mrf.mxu3 }
 0x19b   :  { %v362_v17 = vadd.f32 %v361_v15, %v300_v14  ;;  %v455_v14 = vpop.permute.xlu0 %454 }
 0x19d   :  { %v370_v19 = vadd.f32 %v369_v16, %v362_v17 }
 0x19f   :  { %v371_v21 = vrot.slane %v370_v19, 4 }
 0x1a1   :  { %v372_v26 = vadd.f32 %v371_v21, %v370_v19  ;;  %v445_v21 = vpop.permute.xlu1 %444 }
 0x1a3   :  { %v373_v27 = vrot.slane %v372_v26, 2  ;;  %v516_v24 = vpop.permute.xlu0 %515 }
 0x1a5   :  { %v374_v32 = vadd.f32 %v373_v27, %v372_v26 }
 0x1a7   :  { %v375_v35 = vrot.slane %v374_v32, 1 }
 0x1a9   :  { %v376_v38 = vadd.f32 %v375_v35, %v374_v32 }
 0x1ab   :  { %v384_v39 = vmul.f32 %v1667_v36, %v376_v38 }
 0x1ad   :  { %v385_v33 = vsub.f32 %v345_v60, %v384_v39  ;;  %v386_v41 = vsub.f32 %v347_v58, %v384_v39  ;;  %v387_v42 = vsub.f32 %v350_v0, %v384_v39  ;;  %v388_v44 = vsub.f32 %v352_v1, %v384_v39  ;;  %v480_v58 = vpop.permute.xlu2 %479 }
 0x1ae   :  { %v389_v23 = vsub.f32 %v355_v4, %v384_v39  ;;  %v390_v34 = vsub.f32 %v357_v8, %v384_v39  ;;  %v391_v51 = vsub.f32 %v360_v11, %v384_v39  ;;  %v392_v54 = vsub.f32 %v362_v17, %v384_v39 }
 0x1af   :  { %v393_v45 = vmul.f32 %v385_v33, %v385_v33  ;;  %v394_v46 = vmul.f32 %v386_v41, %v386_v41  ;;  %v395_v25 = vmul.f32 %v387_v42, %v387_v42  ;;  %v396_v49 = vmul.f32 %v388_v44, %v388_v44 }
 0x1b0   :  { %v397_v52 = vmul.f32 %v389_v23, %v389_v23  ;;  %v398_v55 = vmul.f32 %v390_v34, %v390_v34  ;;  %v399_v57 = vmul.f32 %v391_v51, %v391_v51  ;;  %v400_v60 = vmul.f32 %v392_v54, %v392_v54 }
 0x1b1   :  { %v401_v48 = vadd.f32 %v394_v46, %v393_v45 }
 0x1b3   :  { %v402_v50 = vadd.f32 %v401_v48, %v395_v25 }
 0x1b5   :  { %v403_v53 = vadd.f32 %v402_v50, %v396_v49  ;;  %v465_v4 = vpop.permute.xlu2 %464 }
 0x1b7   :  { %v404_v56 = vadd.f32 %v403_v53, %v397_v52 }
 0x1b9   :  { %v405_v59 = vadd.f32 %v404_v56, %v398_v55 }
 0x1bb   :  { %v406_v61 = vadd.f32 %v405_v59, %v399_v57 }
 0x1bd   :  { %v407_v0 = vadd.f32 %v406_v61, %v400_v60  ;;  %v526_v12 = vpop.permute.xlu2 %525  ;;  %v506_v61 = vpop.permute.xlu1 %505 }
 0x1bf   :  { %v408_v1 = vrot.slane %v407_v0, 4 }
 0x1c1   :  { %v409_v2 = vadd.f32 %v408_v1, %v407_v0  ;;  %v501_v0 = vpop.permute.xlu0 %500 }
 0x1c3   :  { %v410_v3 = vrot.slane %v409_v2, 2 }
 0x1c5   :  { %v411_v5 = vadd.f32 %v410_v3, %v409_v2  ;;  %v511_v18 = vpop.permute.xlu2 %510 }
 0x1c7   :  { %v412_v8 = vrot.slane %v411_v5, 1 }
 0x1c9   :  { %v413_v9 = vadd.f32 %v412_v8, %v411_v5 }
 0x1cb   :  { %v414_v10 = vmul.f32 %v413_v9, %v1667_v36 }
 0x1cd   :  { %v415_v11 = vadd.f32 1e-05, %v414_v10  ;;  %v450_v49 = vpop.permute.xlu2 %449 }
 0x1cf   :  { %1246 = vrsqrt.f32 %v415_v11  ;;  %vm422_vm4 = vweird.f32 %v415_v11 }
 0x1d5   :  { %v1247_v15 = vpop.eup %1246 }
 0x1d6   :  { %v417_v16 = vmul.f32 %v1247_v15, %v415_v11  ;;  %vm423_vm3 = vweird.f32 %v1247_v15 }
 0x1d7   :  { %vm424_vm5 = vmor %vm422_vm4, %vm423_vm3 }
 0x1d8   :  { %v418_v17 = vmul.f32 %v1247_v15, %v417_v16 }
 0x1da   :  { %v419_v19 = vmul.f32 0.5, %v418_v17 }
 0x1dc   :  { %v420_v26 = vsub.f32 1.5, %v419_v19 }
 0x1de   :  { %v421_v27 = vmul.f32 %v1247_v15, %v420_v26 }
 0x1e0   :  { %v425_v30 = vsel %vm424_vm5, %v1247_v15, %v421_v27 }
 0x1e1   :  { %v431_v32 = vmul.f32 %v425_v30, %v390_v34  ;;  %v432_v35 = vmul.f32 %v425_v30, %v391_v51  ;;  %v433_v38 = vmul.f32 %v425_v30, %v392_v54  ;;  %v430_v39 = vmul.f32 %v425_v30, %v389_v23 }
 0x1e2   :  { %v428_v45 = vmul.f32 %v425_v30, %v387_v42  ;;  %v429_v46 = vmul.f32 %v425_v30, %v388_v44  ;;  %v426_v25 = vmul.f32 %v425_v30, %v385_v33  ;;  %v427_v48 = vmul.f32 %v425_v30, %v386_v41 }
 0x1e3   :  { %v489_v50 = vmul.f32 %v480_v58, %v433_v38  ;;  %v488_v52 = vmul.f32 %v475_v31, %v432_v35  ;;  %v486_v53 = vmul.f32 %v465_v4, %v430_v39  ;;  %v487_v55 = vmul.f32 %v470_v7, %v431_v32 }
 0x1e4   :  { %v484_v56 = vmul.f32 %v455_v14, %v428_v45  ;;  %v485_v57 = vmul.f32 %v460_v13, %v429_v46  ;;  %v482_v59 = vmul.f32 %v445_v21, %v426_v25  ;;  %v483_v60 = vmul.f32 %v450_v49, %v427_v48 }
 0x1e5   :  { %v1671_v1 = vadd.f32 %v536_v62, %v489_v50  ;;  %v1673_v34 = vadd.f32 %v531_v63, %v488_v52  ;;  %v1675_v23 = vadd.f32 %v521_v6, %v486_v53  ;;  %v1677_v42 = vadd.f32 %v526_v12, %v487_v55 }
 0x1e6   :  { %v1679_v33 = vadd.f32 %v511_v18, %v484_v56  ;;  %v1681_v41 = vadd.f32 %v516_v24, %v485_v57  ;;  %v1683_v44 = vadd.f32 %v501_v0, %v482_v59  ;;  %v1685_v31 = vadd.f32 %v506_v61, %v483_v60 }
 0x1e7   :  { %v552_v51 = vmul.f32 %v1673_v34, %v1673_v34  ;;  %v553_v54 = vmul.f32 %v1671_v1, %v1671_v1  ;;  %v550_v58 = vmul.f32 %v1675_v23, %v1675_v23  ;;  %v551_v62 = vmul.f32 %v1677_v42, %v1677_v42 }
 0x1e8   :  { %v548_v63 = vmul.f32 %v1679_v33, %v1679_v33  ;;  %v549_v2 = vmul.f32 %v1681_v41, %v1681_v41  ;;  %v546_v3 = vmul.f32 %v1683_v44, %v1683_v44  ;;  %v547_v4 = vmul.f32 %v1685_v31, %v1685_v31 }
 0x1e9   :  { %v560_v5 = vmul.f32 %v552_v51, %v1673_v34  ;;  %v561_v6 = vmul.f32 %v553_v54, %v1671_v1  ;;  %v558_v7 = vmul.f32 %v550_v58, %v1675_v23  ;;  %v559_v8 = vmul.f32 %v551_v62, %v1677_v42 }
 0x1ea   :  { %v556_v9 = vmul.f32 %v548_v63, %v1679_v33  ;;  %v557_v10 = vmul.f32 %v549_v2, %v1681_v41  ;;  %v554_v11 = vmul.f32 %v546_v3, %v1683_v44  ;;  %v555_v12 = vmul.f32 %v547_v4, %v1685_v31 }
 0x1eb   :  { %v568_v13 = vmul.f32 0.044715, %v560_v5  ;;  %v569_v14 = vmul.f32 0.044715, %v561_v6  ;;  %v566_v15 = vmul.f32 0.044715, %v558_v7 }
 0x1ec   :  { %v567_v16 = vmul.f32 0.044715, %v559_v8  ;;  %v564_v17 = vmul.f32 0.044715, %v556_v9  ;;  %v565_v18 = vmul.f32 0.044715, %v557_v10 }
 0x1ed   :  { %v576_v19 = vadd.f32 %v568_v13, %v1673_v34  ;;  %v577_v21 = vadd.f32 %v569_v14, %v1671_v1  ;;  %v574_v24 = vadd.f32 %v566_v15, %v1675_v23  ;;  %v562_v26 = vmul.f32 0.044715, %v554_v11 }
 0x1ee   :  { %v575_v27 = vadd.f32 %v567_v16, %v1677_v42  ;;  %v572_v30 = vadd.f32 %v564_v17, %v1679_v33  ;;  %v573_v32 = vadd.f32 %v565_v18, %v1681_v41  ;;  %v563_v35 = vmul.f32 0.044715, %v555_v12 }
 0x1ef   :  { %v584_v38 = vmul.f32 0.7978846, %v576_v19  ;;  %v585_v39 = vmul.f32 0.7978846, %v577_v21  ;;  %v582_v45 = vmul.f32 0.7978846, %v574_v24  ;;  %v570_v46 = vadd.f32 %v562_v26, %v1683_v44 }
 0x1f0   :  { %v583_v25 = vmul.f32 0.7978846, %v575_v27  ;;  %v571_v48 = vadd.f32 %v563_v35, %v1685_v31  ;;  %v580_v49 = vmul.f32 0.7978846, %v572_v30  ;;  %v581_v50 = vmul.f32 0.7978846, %v573_v32  ;;  %v651_v32 = vpop.permute.xlu2 %650 }
 0x1f1   :  { %1248 = vtanh.f32 %v584_v38  ;;  %v578_v52 = vmul.f32 0.7978846, %v570_v46  ;;  %v656_v38 = vpop.permute.xlu0 %655 }
 0x1f2   :  { %1250 = vtanh.f32 %v585_v39  ;;  %v579_v53 = vmul.f32 0.7978846, %v571_v48 }
 0x1f3   :  { %1252 = vtanh.f32 %v582_v45  ;;  %v661_v45 = vpop.permute.xlu1 %660 }
 0x1f4   :  { %1254 = vtanh.f32 %v583_v25 }
 0x1f5   :  { %1256 = vtanh.f32 %v580_v49 }
 0x1f6   :  { %1258 = vtanh.f32 %v581_v50 }
 0x1f7   :  { %v1249_v55 = vpop.eup %1248  ;;  %1260 = vtanh.f32 %v578_v52 }
 0x1f8   :  { %v1251_v56 = vpop.eup %1250  ;;  %v600_v57 = vadd.f32 1.0, %v1249_v55  ;;  %1262 = vtanh.f32 %v579_v53  ;;  %v666_v48 = vpop.permute.xlu2 %665 }
 0x1f9   :  { %v1253_v59 = vpop.eup %1252  ;;  %v601_v60 = vadd.f32 1.0, %v1251_v56  ;;  %v671_v52 = vpop.permute.xlu0 %670 }
 0x1fa   :  { %v1255_v61 = vpop.eup %1254  ;;  %v608_v0 = vmul.f32 0.5, %v600_v57  ;;  %v598_v51 = vadd.f32 1.0, %v1253_v59 }
 0x1fb   :  { %v1257_v54 = vpop.eup %1256  ;;  %v609_v58 = vmul.f32 0.5, %v601_v60  ;;  %v599_v62 = vadd.f32 1.0, %v1255_v61  ;;  %v676_v60 = vpop.permute.xlu1 %675 }
 0x1fc   :  { %v1259_v63 = vpop.eup %1258  ;;  %v616_v2 = vmul.f32 %v608_v0, %v1673_v34  ;;  %v606_v3 = vmul.f32 0.5, %v598_v51  ;;  %v596_v4 = vadd.f32 1.0, %v1257_v54 }
 0x1fd   :  { %v1261_v5 = vpop.eup %1260  ;;  %v617_v6 = vmul.f32 %v609_v58, %v1671_v1  ;;  %v607_v7 = vmul.f32 0.5, %v599_v62  ;;  %v597_v8 = vadd.f32 1.0, %v1259_v63 }
 0x1fe   :  { %v1263_v9 = vpop.eup %1262  ;;  %v1722_v10 = vadd.f32 %v616_v2, %v1621_v28  ;;  %v614_v11 = vmul.f32 %v606_v3, %v1675_v23  ;;  %v604_v12 = vmul.f32 0.5, %v596_v4  ;;  %v594_v13 = vadd.f32 1.0, %v1261_v5 }
 0x1ff   :  { %v1726_v14 = vadd.f32 %v617_v6, %v1623_v29  ;;  %v615_v34 = vmul.f32 %v607_v7, %v1677_v42  ;;  %v605_v15 = vmul.f32 0.5, %v597_v8  ;;  %v595_v16 = vadd.f32 1.0, %v1263_v9 }
 0x200   :  { %v1730_v17 = vadd.f32 %v614_v11, %v1631_v40  ;;  %v612_v1 = vmul.f32 %v604_v12, %v1679_v33  ;;  %v602_v18 = vmul.f32 0.5, %v594_v13  ;;  %v681_v51 = vpop.permute.xlu2 %680 }
 0x201   :  { %v638_v28 = vpack.c.bf16 %v1726_v14, %v1722_v10  ;;  %v1736_v23 = vadd.f32 %v615_v34, %v1628_v37  ;;  %v613_v19 = vmul.f32 %v605_v15, %v1681_v41  ;;  %v603_v29 = vmul.f32 0.5, %v595_v16  ;;  %v686_v63 = vpop.permute.xlu0 %685 }
 0x202   :  { %v1740_v42 = vadd.f32 %v612_v1, %v1639_v20  ;;  %v610_v21 = vmul.f32 %v602_v18, %v1683_v44  ;;  %v1210_v44 = vld [vmem:[%s1847_s3 + $0x20] sm:$0xff] }
 0x203   :  { %724 = vmatpush.bf16.msrb.mxu1 %v638_v28  ;;  %1218 = vmatpush.bf16.msra.mxu2 %v638_v28  ;;  %v637_v40 = vpack.c.bf16 %v1736_v23, %v1730_v17  ;;  %v1745_v33 = vadd.f32 %v613_v19, %v1636_v43  ;;  %v611_v24 = vmul.f32 %v603_v29, %v1685_v31  ;;  %v1211_v31 = vld [vmem:[%s1847_s3 + $0x28] sm:$0xff] }
 0x204   :  { %v1752_v41 = vadd.f32 %v610_v21, %v1647_v47  ;;  %v1213_v47 = vld [vmem:[%s1847_s3 + $0x38] sm:$0xff]  ;;  %v824_v21 = vpop.permute.xlu1 %823 }
 0x205   :  { %v636_v37 = vpack.c.bf16 %v1745_v33, %v1740_v42  ;;  %v1755_v20 = vadd.f32 %v611_v24, %v1644_v22  ;;  %v1212_v22 = vld [vmem:[%s1847_s3 + $0x30] sm:$0xff]  ;;  %s1310_s3 = smov [#allocation3]  }
 0x206   :  { %s1089_s14 = sshll.u32 %s1310_s3, 4  ;;  %s1090_s14 = int_to_ptr.vmem [resolvable:$true] %s1089_s14 }
 0x207   :  { %725 = vmatpush.bf16.msrb.mxu1 %v637_v40  ;;  %1219 = vmatpush.bf16.msra.mxu2 %v637_v40  ;;  %v635_v43 = vpack.c.bf16 %v1755_v20, %v1752_v41 }
 0x20b   :  { %726 = vmatpush.bf16.msrb.mxu1 %v636_v37  ;;  %1220 = vmatpush.bf16.msra.mxu2 %v636_v37 }
 0x20f   :  { %727 = vmatpush.bf16.msrb.mxu1 %v635_v43  ;;  %1221 = vmatpush.bf16.msra.mxu2 %v635_v43 }
 0x212   :  { %1180 = vmatmul.msk.bf16.vlgmr.msrb.gmra.mxu1 %vm322_vm1, %v1210_v44  ;;  %1181 = vmatmul.msk.bf16.vlgmr.msra.gmra.mxu2 %vm322_vm1, %v1211_v31 }
 0x222   :  { %1182 = vmatmul.msk.bf16.gmra.mxu2 %vm322_vm1, %v1212_v22 }
 0x232   :  { %1183 = vmatmul.msk.bf16.gmra.mxu2 %vm322_vm1, %v1213_v47 }
 0x28f   :  { %v729_v30 = vpop.f32.mrf.mxu1 }
 0x290   :  { %v730_v49 = vadd.f32 %v729_v30, %v651_v32 }
 0x295   :  { %v734_v26 = vpop.f32.mrf.mxu2 }
 0x296   :  { %v735_v53 = vadd.f32 %v734_v26, %v661_v45  ;;  %v839_v45 = vpop.permute.xlu1 %838 }
 0x297   :  { %v731_v39 = vpop.f32.mrf.mxu1 }
 0x298   :  { %v732_v25 = vadd.f32 %v731_v39, %v656_v38  ;;  %v829_v39 = vpop.permute.xlu2 %828 }
 0x29a   :  { %v749_v50 = vadd.f32 %v732_v25, %v730_v49 }
 0x29c   :  { %v750_v57 = vadd.f32 %v749_v50, %v735_v53 }
 0x29d   :  { %v736_v27 = vpop.f32.mrf.mxu2 }
 0x29e   :  { %v737_v55 = vadd.f32 %v736_v27, %v666_v48 }
 0x2a0   :  { %v751_v61 = vadd.f32 %v750_v57, %v737_v55 }
 0x2a5   :  { %v739_v35 = vpop.f32.mrf.mxu2 }
 0x2a6   :  { %v740_v59 = vadd.f32 %v739_v35, %v671_v52 }
 0x2a8   :  { %v752_v54 = vadd.f32 %v751_v61, %v740_v59 }
 0x2ad   :  { %v741_v46 = vpop.f32.mrf.mxu2 }
 0x2ae   :  { %v742_v0 = vadd.f32 %v741_v46, %v676_v60  ;;  %v834_v46 = vpop.permute.xlu0 %833 }
 0x2b0   :  { %v753_v62 = vadd.f32 %v752_v54, %v742_v0 }
 0x2b5   :  { %v744_v56 = vpop.f32.mrf.mxu2 }
 0x2b6   :  { %v745_v58 = vadd.f32 %v744_v56, %v681_v51  ;;  %v849_v56 = vpop.permute.xlu0 %848 }
 0x2b8   :  { %v754_v3 = vadd.f32 %v753_v62, %v745_v58 }
 0x2bd   :  { %v746_v2 = vpop.f32.mrf.mxu2 }
 0x2be   :  { %v747_v4 = vadd.f32 %v746_v2, %v686_v63  ;;  %v881_v54 = vpop.permute.xlu0 %880 }
 0x2c0   :  { %v755_v5 = vadd.f32 %v754_v3, %v747_v4 }
 0x2c2   :  { %v756_v6 = vrot.slane %v755_v5, 4 }
 0x2c4   :  { %v757_v7 = vadd.f32 %v756_v6, %v755_v5 }
 0x2c6   :  { %v758_v8 = vrot.slane %v757_v7, 2  ;;  %v896_v5 = vpop.permute.xlu0 %895 }
 0x2c8   :  { %v759_v9 = vadd.f32 %v758_v8, %v757_v7 }
 0x2ca   :  { %v760_v11 = vrot.slane %v759_v9, 1 }
 0x2cc   :  { %v761_v12 = vadd.f32 %v760_v11, %v759_v9 }
 0x2ce   :  { %v762_v13 = vmul.f32 %v761_v12, %v1667_v36 }
 0x2d0   :  { %v763_v34 = vsub.f32 %v730_v49, %v762_v13  ;;  %v764_v15 = vsub.f32 %v732_v25, %v762_v13  ;;  %v765_v16 = vsub.f32 %v735_v53, %v762_v13  ;;  %v766_v1 = vsub.f32 %v737_v55, %v762_v13  ;;  %v844_v53 = vpop.permute.xlu2 %843  ;;  %v854_v55 = vpop.permute.xlu1 %853 }
 0x2d1   :  { %v767_v19 = vsub.f32 %v740_v59, %v762_v13  ;;  %v768_v24 = vsub.f32 %v742_v0, %v762_v13  ;;  %v769_v44 = vsub.f32 %v745_v58, %v762_v13  ;;  %v770_v47 = vsub.f32 %v747_v4, %v762_v13 }
 0x2d2   :  { %v771_v18 = vmul.f32 %v763_v34, %v763_v34  ;;  %v772_v28 = vmul.f32 %v764_v15, %v764_v15  ;;  %v773_v29 = vmul.f32 %v765_v16, %v765_v16  ;;  %v774_v37 = vmul.f32 %v766_v1, %v766_v1 }
 0x2d3   :  { %v775_v31 = vmul.f32 %v767_v19, %v767_v19  ;;  %v776_v26 = vmul.f32 %v768_v24, %v768_v24  ;;  %v777_v30 = vmul.f32 %v769_v44, %v769_v44  ;;  %v778_v35 = vmul.f32 %v770_v47, %v770_v47 }
 0x2d4   :  { %v779_v40 = vadd.f32 %v772_v28, %v771_v18 }
 0x2d6   :  { %v780_v43 = vadd.f32 %v779_v40, %v773_v29 }
 0x2d8   :  { %v781_v22 = vadd.f32 %v780_v43, %v774_v37  ;;  %v859_v0 = vpop.permute.xlu2 %858  ;;  %v886_v51 = vpop.permute.xlu1 %885 }
 0x2da   :  { %v782_v27 = vadd.f32 %v781_v22, %v775_v31 }
 0x2dc   :  { %v783_v32 = vadd.f32 %v782_v27, %v776_v26 }
 0x2de   :  { %v784_v38 = vadd.f32 %v783_v32, %v777_v30 }
 0x2e0   :  { %v785_v25 = vadd.f32 %v784_v38, %v778_v35  ;;  %v891_v2 = vpop.permute.xlu2 %890  ;;  %v901_v4 = vpop.permute.xlu1 %900 }
 0x2e1   :  { %v911_v38 = vpop.permute.xlu0 %910 }
 0x2e2   :  { %v786_v48 = vrot.slane %v785_v25, 4 }
 0x2e4   :  { %v787_v49 = vadd.f32 %v786_v48, %v785_v25 }
 0x2e6   :  { %v788_v50 = vrot.slane %v787_v49, 2 }
 0x2e8   :  { %v789_v52 = vadd.f32 %v788_v50, %v787_v49  ;;  %v906_v22 = vpop.permute.xlu2 %905  ;;  %v916_v35 = vpop.permute.xlu1 %915 }
 0x2ea   :  { %v790_v57 = vrot.slane %v789_v52, 1 }
 0x2ec   :  { %v791_v59 = vadd.f32 %v790_v57, %v789_v52 }
 0x2ee   :  { %v792_v60 = vmul.f32 %v791_v59, %v1667_v36 }
 0x2f0   :  { %v793_v61 = vadd.f32 1e-05, %v792_v60 }
 0x2f2   :  { %1264 = vrsqrt.f32 %v793_v61  ;;  %vm800_vm7 = vweird.f32 %v793_v61 }
 0x2f8   :  { %v1265_v58 = vpop.eup %1264 }
 0x2f9   :  { %v795_v62 = vmul.f32 %v1265_v58, %v793_v61  ;;  %vm801_vm6 = vweird.f32 %v1265_v58 }
 0x2fa   :  { %vm802_vm8 = vmor %vm800_vm7, %vm801_vm6 }
 0x2fb   :  { %v796_v63 = vmul.f32 %v1265_v58, %v795_v62 }
 0x2fd   :  { %v797_v3 = vmul.f32 0.5, %v796_v63 }
 0x2ff   :  { %v798_v6 = vsub.f32 1.5, %v797_v3 }
 0x301   :  { %v799_v7 = vmul.f32 %v1265_v58, %v798_v6 }
 0x303   :  { %v803_v8 = vsel %vm802_vm8, %v1265_v58, %v799_v7 }
 0x304   :  { %v804_v9 = vmul.f32 %v803_v8, %v763_v34  ;;  %v805_v36 = vmul.f32 %v803_v8, %v764_v15  ;;  %v806_v11 = vmul.f32 %v803_v8, %v765_v16  ;;  %v807_v12 = vmul.f32 %v803_v8, %v766_v1 }
 0x305   :  { %v808_v13 = vmul.f32 %v803_v8, %v767_v19  ;;  %v809_v18 = vmul.f32 %v803_v8, %v768_v24  ;;  %v810_v28 = vmul.f32 %v803_v8, %v769_v44  ;;  %v811_v29 = vmul.f32 %v803_v8, %v770_v47 }
 0x306   :  { %v861_v40 = vmul.f32 %v824_v21, %v804_v9  ;;  %v862_v37 = vmul.f32 %v829_v39, %v805_v36  ;;  %v863_v43 = vmul.f32 %v834_v46, %v806_v11  ;;  %v864_v31 = vmul.f32 %v839_v45, %v807_v12 }
 0x307   :  { %v865_v26 = vmul.f32 %v844_v53, %v808_v13  ;;  %v866_v27 = vmul.f32 %v849_v56, %v809_v18  ;;  %v867_v30 = vmul.f32 %v854_v55, %v810_v28  ;;  %v868_v32 = vmul.f32 %v859_v0, %v811_v29 }
 0x308   :  { %v1777_v25 = vadd.f32 %v881_v54, %v861_v40  ;;  %v1779_v34 = vadd.f32 %v886_v51, %v862_v37  ;;  %v1781_v15 = vadd.f32 %v891_v2, %v863_v43  ;;  %v1783_v16 = vadd.f32 %v896_v5, %v864_v31  ;;  %v1017_v31 = vpop.permute.xlu2 %1016 }
 0x309   :  { %v1785_v1 = vadd.f32 %v901_v4, %v865_v26  ;;  %v1787_v19 = vadd.f32 %v906_v22, %v866_v27  ;;  %v1789_v21 = vadd.f32 %v911_v38, %v867_v30  ;;  %v1791_v24 = vadd.f32 %v916_v35, %v868_v32  ;;  %v1022_v27 = vpop.permute.xlu0 %1021 }
 0x30a   :  { %v926_v44 = vmul.f32 %v1777_v25, %v1777_v25  ;;  %v927_v47 = vmul.f32 %v1779_v34, %v1779_v34  ;;  %v928_v39 = vmul.f32 %v1781_v15, %v1781_v15  ;;  %v929_v45 = vmul.f32 %v1783_v16, %v1783_v16 }
 0x30b   :  { %v930_v46 = vmul.f32 %v1785_v1, %v1785_v1  ;;  %v931_v48 = vmul.f32 %v1787_v19, %v1787_v19  ;;  %v932_v49 = vmul.f32 %v1789_v21, %v1789_v21  ;;  %v933_v50 = vmul.f32 %v1791_v24, %v1791_v24 }
 0x30c   :  { %v934_v52 = vmul.f32 %v926_v44, %v1777_v25  ;;  %v935_v53 = vmul.f32 %v927_v47, %v1779_v34  ;;  %v936_v55 = vmul.f32 %v928_v39, %v1781_v15  ;;  %v937_v56 = vmul.f32 %v929_v45, %v1783_v16 }
 0x30d   :  { %v938_v57 = vmul.f32 %v930_v46, %v1785_v1  ;;  %v939_v59 = vmul.f32 %v931_v48, %v1787_v19  ;;  %v940_v60 = vmul.f32 %v932_v49, %v1789_v21  ;;  %v941_v61 = vmul.f32 %v933_v50, %v1791_v24 }
 0x30e   :  { %v942_v0 = vmul.f32 0.044715, %v934_v52  ;;  %v943_v51 = vmul.f32 0.044715, %v935_v53  ;;  %v944_v54 = vmul.f32 0.044715, %v936_v55 }
 0x30f   :  { %v945_v58 = vmul.f32 0.044715, %v937_v56  ;;  %v946_v62 = vmul.f32 0.044715, %v938_v57  ;;  %v947_v63 = vmul.f32 0.044715, %v939_v59  ;;  %v1027_v59 = vpop.permute.xlu1 %1026 }
 0x310   :  { %v948_v2 = vmul.f32 0.044715, %v940_v60  ;;  %v949_v3 = vmul.f32 0.044715, %v941_v61  ;;  %v950_v4 = vadd.f32 %v942_v0, %v1777_v25  ;;  %v951_v5 = vadd.f32 %v943_v51, %v1779_v34 }
 0x311   :  { %v952_v6 = vadd.f32 %v944_v54, %v1781_v15  ;;  %v953_v7 = vadd.f32 %v945_v58, %v1783_v16  ;;  %v954_v8 = vadd.f32 %v946_v62, %v1785_v1  ;;  %v955_v36 = vadd.f32 %v947_v63, %v1787_v19  ;;  %v1032_v63 = vpop.permute.xlu2 %1031 }
 0x312   :  { %v957_v9 = vadd.f32 %v949_v3, %v1791_v24  ;;  %v958_v11 = vmul.f32 0.7978846, %v950_v4  ;;  %v959_v12 = vmul.f32 0.7978846, %v951_v5  ;;  %v956_v13 = vadd.f32 %v948_v2, %v1789_v21 }
 0x313   :  { %v960_v18 = vmul.f32 0.7978846, %v952_v6  ;;  %v961_v29 = vmul.f32 0.7978846, %v953_v7  ;;  %v962_v40 = vmul.f32 0.7978846, %v954_v8  ;;  %v1037_v8 = vpop.permute.xlu0 %1036 }
 0x314   :  { %v965_v28 = vmul.f32 0.7978846, %v957_v9  ;;  %1266 = vtanh.f32 %v958_v11  ;;  %v963_v37 = vmul.f32 0.7978846, %v955_v36  ;;  %v964_v43 = vmul.f32 0.7978846, %v956_v13 }
 0x315   :  { %1268 = vtanh.f32 %v959_v12 }
 0x316   :  { %1270 = vtanh.f32 %v965_v28 }
 0x317   :  { %1272 = vtanh.f32 %v960_v18 }
 0x318   :  { %1274 = vtanh.f32 %v961_v29  ;;  %v1042_v29 = vpop.permute.xlu1 %1041 }
 0x319   :  { %1276 = vtanh.f32 %v962_v40 }
 0x31a   :  { %v1267_v22 = vpop.eup %1266  ;;  %1278 = vtanh.f32 %v963_v37 }
 0x31b   :  { %v1269_v26 = vpop.eup %1268  ;;  %1280 = vtanh.f32 %v964_v43  ;;  %v974_v30 = vadd.f32 1.0, %v1267_v22  ;;  %v1052_v43 = vpop.permute.xlu0 %1051 }
 0x31c   :  { %v1271_v32 = vpop.eup %1270  ;;  %v975_v35 = vadd.f32 1.0, %v1269_v26 }
 0x31d   :  { %v1273_v38 = vpop.eup %1272  ;;  %v982_v44 = vmul.f32 0.5, %v974_v30  ;;  %v981_v48 = vadd.f32 1.0, %v1271_v32 }
 0x31e   :  { %v1275_v47 = vpop.eup %1274  ;;  %v976_v39 = vadd.f32 1.0, %v1273_v38  ;;  %v983_v45 = vmul.f32 0.5, %v975_v35 }
 0x31f   :  { %v1277_v46 = vpop.eup %1276  ;;  %v977_v49 = vadd.f32 1.0, %v1275_v47  ;;  %v990_v50 = vmul.f32 %v982_v44, %v1777_v25  ;;  %v989_v2 = vmul.f32 0.5, %v981_v48 }
 0x320   :  { %v1279_v52 = vpop.eup %1278  ;;  %v978_v53 = vadd.f32 1.0, %v1277_v46  ;;  %v984_v55 = vmul.f32 0.5, %v976_v39  ;;  %v991_v56 = vmul.f32 %v983_v45, %v1779_v34  ;;  %v1079_v32 = vpop.permute.xlu1 %1078 }
 0x321   :  { %v1281_v57 = vpop.eup %1280  ;;  %v979_v60 = vadd.f32 1.0, %v1279_v52  ;;  %v985_v61 = vmul.f32 0.5, %v977_v49  ;;  %v998_v0 = vadd.f32 %v990_v50, %v1752_v41 }
 0x322   :  { %v980_v51 = vadd.f32 1.0, %v1281_v57  ;;  %v986_v54 = vmul.f32 0.5, %v978_v53  ;;  %v992_v58 = vmul.f32 %v984_v55, %v1781_v15  ;;  %v999_v62 = vadd.f32 %v991_v56, %v1755_v20 }
 0x323   :  { %v987_v25 = vmul.f32 0.5, %v979_v60  ;;  %v993_v3 = vmul.f32 %v985_v61, %v1783_v16  ;;  %v1054_v4 = vmul.f32 %v1017_v31, %v998_v0  ;;  %v997_v16 = vmul.f32 %v989_v2, %v1791_v24 }
 0x324   :  { %v988_v5 = vmul.f32 0.5, %v980_v51  ;;  %v994_v34 = vmul.f32 %v986_v54, %v1785_v1  ;;  %v1000_v6 = vadd.f32 %v992_v58, %v1740_v42  ;;  %v1055_v7 = vmul.f32 %v1022_v27, %v999_v62 }
 0x325   :  { %v995_v41 = vmul.f32 %v987_v25, %v1787_v19  ;;  %v1001_v9 = vadd.f32 %v993_v3, %v1745_v33  ;;  %v1005_v19 = vadd.f32 %v997_v16, %v1726_v14  ;;  %v1081_v14 = vperm.slane %v1079_v32, 0 }
 0x326   :  { %v996_v15 = vmul.f32 %v988_v5, %v1789_v21  ;;  %v1002_v20 = vadd.f32 %v994_v34, %v1730_v17  ;;  %v1056_v36 = vmul.f32 %v1027_v59, %v1000_v6  ;;  %v1062_v11 = vadd.f32 %v1055_v7, %v1054_v4  ;;  %v1047_v21 = vpop.permute.xlu2 %1046 }
 0x327   :  { %v1003_v12 = vadd.f32 %v995_v41, %v1736_v23  ;;  %v1057_v13 = vmul.f32 %v1032_v63, %v1001_v9  ;;  %v1061_v31 = vmul.f32 %v1052_v43, %v1005_v19 }
 0x328   :  { %v1063_v1 = vadd.f32 %v1062_v11, %v1056_v36  ;;  %v1004_v42 = vadd.f32 %v996_v15, %v1722_v10  ;;  %v1058_v18 = vmul.f32 %v1037_v8, %v1002_v20 }
 0x329   :  { %v1059_v33 = vmul.f32 %v1042_v29, %v1003_v12 }
 0x32a   :  { %v1064_v28 = vadd.f32 %v1063_v1, %v1057_v13  ;;  %v1060_v37 = vmul.f32 %v1047_v21, %v1004_v42 }
 0x32c   :  { %v1065_v40 = vadd.f32 %v1064_v28, %v1058_v18 }
 0x32e   :  { %v1066_v17 = vadd.f32 %v1065_v40, %v1059_v33 }
 0x330   :  { %v1067_v22 = vadd.f32 %v1066_v17, %v1060_v37 }
 0x332   :  { %v1068_v24 = vadd.f32 %v1067_v22, %v1061_v31 }
 0x334   :  { %v1069_v26 = vrot.slane %v1068_v24, 4 }
 0x336   :  { %v1070_v23 = vadd.f32 %v1069_v26, %v1068_v24 }
 0x338   :  { %v1071_v27 = vrot.slane %v1070_v23, 2 }
 0x33a   :  { %v1072_v30 = vadd.f32 %v1071_v27, %v1070_v23 }
 0x33c   :  { %v1073_v10 = vrot.slane %v1072_v30, 1 }
 0x33e   :  { %v1074_v35 = vadd.f32 %v1073_v10, %v1072_v30 }
 0x340   :  { %v1082_v38 = vadd.f32 %v1081_v14, %v1074_v35 }
 0x342   :  { %1083 = vst [vmem:[#allocation3] sm:$0x1] %v1082_v38 }
 0x343   :  { %1094 = dma.vmem_to_hbm [thread:$0]  %s1090_s14, 16, %s1092_s4, [#allocation4]  }
 0x344   :  { %1306 = dma.done.wait [#allocation4], 16  }
 0x345   :  { %1307 = vsyncadd [#allocation4], 4294967280 }
 0x346   :  { %1099 = vsyncpa [#allocation4], 1 }

</bundles_post_ra>
